<compile_context>
chip_gen: v6e
topology: v6e:2x2x1
jax: 0.10.0
libtpu: 0.0.40
codegen_flags: <defaults>
</compile_context>

<pallas_src>
import functools

import jax
import jax.numpy as jnp
from jax.experimental import pallas as pl
from jax.experimental.pallas import tpu as pltpu


def _sigmoid(z):
    # tanh form: runs on the EUP and is numerically stable for large |z|.
    return 0.5 * (jnp.tanh(0.5 * z) + 1.0)


def _spatial_attention_mixed_kernel(
    x_ref,      # (B, C, HWp)   f32  input, spatial axis flattened & lane-padded
    masks_ref,  # (9, 1, HWp)   f32  precomputed border-validity mask per conv tap
    cwt_ref,    # (9, C, 1)     f32  3x3 conv taps, tap-major, channels on sublanes
    mlp_ref,    # (C+1, 2Cr+1)  f32  packed channel-MLP params (see wrapper)
    scal_ref,   # (3,)          f32  SMEM: [softmax(w)[0], softmax(w)[1], conv bias]
    out_ref,    # (B, C, HWp)   f32
    *, W, HW, C, Cr,
):
    x = x_ref[...]                                                 # (B, C, HWp)
    HWp = x.shape[-1]

    w_ch = scal_ref[0]
    w_sp = scal_ref[1]
    cb = scal_ref[2]

    # --- channel attention: GAP -> 1x1 conv -> ReLU -> 1x1 conv -> sigmoid --
    w1t = mlp_ref[:C, :Cr]                                         # (C, Cr)
    w2e = mlp_ref[:C, Cr:2 * Cr]                                   # (C, Cr)
    b2 = mlp_ref[:C, 2 * Cr:2 * Cr + 1]                            # (C, 1)
    b1 = mlp_ref[C:C + 1, :Cr]                                     # (1, Cr)

    gap = jnp.sum(x, axis=-1, keepdims=True) * (1.0 / HW)          # (B, C, 1)
    h1 = jnp.sum(gap * w1t, axis=1, keepdims=True) + b1            # (B, 1, Cr)
    h1 = jnp.maximum(h1, 0.0)
    ca = _sigmoid(jnp.sum(h1 * w2e, axis=-1, keepdims=True) + b2)  # (B, C, 1)

    # --- spatial attention: 3x3 conv (C -> 1, zero padding) -> sigmoid ------
    # Channel-reduce first per tap, then a small XLU lane roll + precomputed mask.
    acc = None
    for dh in (-1, 0, 1):
        for dw in (-1, 0, 1):
            t = (dh + 1) * 3 + (dw + 1)
            s = dh * W + dw
            y = jnp.sum(x * cwt_ref[t], axis=1, keepdims=True)     # (B, 1, HWp)
            if s != 0:
                # y'[i] = y[i + s] on the flattened spatial axis (wraps masked off).
                y = pltpu.roll(y, shift=(-s) % HWp, axis=2)
            y = y * masks_ref[t]                                   # zero-padding mask
            acc = y if acc is None else acc + y
    sa = _sigmoid(acc + cb)                                        # (B, 1, HWp)

    # --- factored epilogue ---------------------------------------------------
    out_ref[...] = x * (w_ch * ca + w_sp * sa)


def spatial_attention_mixed(x, params):
    """x: (B, C, H, W) f32.  params mirror the PyTorch module's parameters:
    (w1:(C//4,C,1,1), b1:(C//4,), w2:(C,C//4,1,1), b2:(C,), cw:(1,C,3,3), cb:(1,), mixw:(2,))."""
    w1, b1, w2, b2, cw, cb, mixw = params
    x = jnp.asarray(x, jnp.float32)
    B, C, H, W = x.shape
    Cr = w1.shape[0]
    HW = H * W
    HWp = max(128, ((HW + 127) // 128) * 128)      # lane-dense spatial axis

    x3 = x.reshape(B, C, HW)
    if HWp != HW:
        x3 = jnp.pad(x3, ((0, 0), (0, 0), (0, HWp - HW)))

    # Precomputed 3x3 zero-padding validity masks, tap-major: (9, 1, HWp) f32.
    idx = jnp.arange(HWp, dtype=jnp.int32)
    hh = idx // W
    ww = idx % W
    in_img = idx < HW
    mask_list = []
    for dh in (-1, 0, 1):
        for dw in (-1, 0, 1):
            m = ((hh + dh >= 0) & (hh + dh < H) &
                 (ww + dw >= 0) & (ww + dw < W) & in_img)
            mask_list.append(m)
    masks = jnp.stack(mask_list).astype(jnp.float32).reshape(9, 1, HWp)

    # 3x3 conv taps, tap-major, channels on sublanes: (9, C, 1).
    cwt = jnp.transpose(jnp.asarray(cw, jnp.float32).reshape(C, 9))[:, :, None]

    # Channel-MLP parameters packed into one (C+1, 2*Cr+1) slab (a single VMEM tile):
    #   [:C, :Cr]      = W1^T  (fc1, laid out (c, r))
    #   [:C, Cr:2Cr]   = W2    (fc2, laid out (c, r))
    #   [:C, 2Cr]      = b2
    #   [C,  :Cr]      = b1
    w1t = jnp.transpose(jnp.asarray(w1, jnp.float32).reshape(Cr, C))
    w2e = jnp.asarray(w2, jnp.float32).reshape(C, Cr)
    mlp = jnp.zeros((C + 1, 2 * Cr + 1), jnp.float32)
    mlp = mlp.at[:C, :Cr].set(w1t)
    mlp = mlp.at[:C, Cr:2 * Cr].set(w2e)
    mlp = mlp.at[:C, 2 * Cr].set(jnp.asarray(b2, jnp.float32).reshape(C))
    mlp = mlp.at[C, :Cr].set(jnp.asarray(b1, jnp.float32).reshape(Cr))

    # Mixing weights (softmax done outside the kernel) + conv bias as SMEM scalars.
    mix = jax.nn.softmax(jnp.asarray(mixw, jnp.float32).reshape(2))
    scal = jnp.concatenate([mix, jnp.asarray(cb, jnp.float32).reshape(1)])    # (3,)

    kernel = functools.partial(_spatial_attention_mixed_kernel,
                               W=W, HW=HW, C=C, Cr=Cr)
    vmem = pl.BlockSpec(memory_space=pltpu.MemorySpace.VMEM)
    smem = pl.BlockSpec(memory_space=pltpu.MemorySpace.SMEM)

    out = pl.pallas_call(
        kernel,
        out_shape=jax.ShapeDtypeStruct((B, C, HWp), jnp.float32),
        in_specs=[vmem, vmem, vmem, vmem, smem],
        out_specs=vmem,
        cost_estimate=pl.CostEstimate(
            flops=int(B * C * HWp * (2 * 9 + 6)),
            transcendentals=int(B * C + B * HWp),
            bytes_accessed=int(4 * (2 * B * C * HWp + 9 * HWp + 9 * C
                                    + (C + 1) * (2 * Cr + 1) + 3)),
        ),
    )(x3, masks, cwt, mlp, scal)

    if HWp != HW:
        out = out[..., :HW]
    return out.reshape(B, C, H, W)


def spatial_attention_mixed_ref(x, params):
    """Pure-JAX reference matching the PyTorch forward exactly."""
    w1, b1, w2, b2, cw, cb, mixw = params
    B, C, H, W = x.shape
    Cr = w1.shape[0]
    mix = jax.nn.softmax(mixw)
    gap = jnp.mean(x, axis=(2, 3))                                      # (B, C)
    h = jax.nn.relu(gap @ w1.reshape(Cr, C).T + b1)                     # (B, Cr)
    ca = jax.nn.sigmoid(h @ w2.reshape(C, Cr).T + b2)                   # (B, C)
    channel_out = x * ca[:, :, None, None]
    sa_logit = jax.lax.conv_general_dilated(
        x, cw, window_strides=(1, 1), padding="SAME",
        dimension_numbers=("NCHW", "OIHW", "NCHW")) + cb.reshape(1, 1, 1, 1)
    spatial_out = x * jax.nn.sigmoid(sa_logit)
    return mix[0] * channel_out + mix[1] * spatial_out


if __name__ == "__main__":
    key = jax.random.PRNGKey(0)
    B, C, H, W = 2, 8, 16, 16
    Cr = C // 4
    ks = jax.random.split(key, 8)
    x = jax.random.normal(ks[0], (B, C, H, W), jnp.float32)
    w1 = jax.random.normal(ks[1], (Cr, C, 1, 1), jnp.float32) * 0.3
    b1 = jax.random.normal(ks[2], (Cr,), jnp.float32) * 0.1
    w2 = jax.random.normal(ks[3], (C, Cr, 1, 1), jnp.float32) * 0.3
    b2 = jax.random.normal(ks[4], (C,), jnp.float32) * 0.1
    cw = jax.random.normal(ks[5], (1, C, 3, 3), jnp.float32) * 0.2
    cb = jax.random.normal(ks[6], (1,), jnp.float32) * 0.1
    mixw = jax.random.normal(ks[7], (2,), jnp.float32)
    params = (w1, b1, w2, b2, cw, cb, mixw)

    out = spatial_attention_mixed(x, params)
    out = jax.block_until_ready(out)

    ref = spatial_attention_mixed_ref(x, params)
    assert out.shape == (B, C, H, W)
    err = float(jnp.max(jnp.abs(out - ref)))
    assert jnp.allclose(out, ref, rtol=1e-4, atol=1e-5), ("max abs err", err)
    print("KERNEL_OK")
</pallas_src>

<mosaic_0001>
module attributes {stable_mosaic.version = 11 : i64} {
  func.func @_spatial_attention_mixed_kernel(%arg0: memref<2x8x256xf32, #tpu.memory_space<vmem>>, %arg1: memref<9x1x256xf32, #tpu.memory_space<vmem>>, %arg2: memref<9x8x1xf32, #tpu.memory_space<vmem>>, %arg3: memref<9x5xf32, #tpu.memory_space<vmem>>, %arg4: memref<3xf32, #tpu.memory_space<smem>>, %arg5: memref<2x8x256xf32, #tpu.memory_space<vmem>>) attributes {dimension_semantics = [], scalar_prefetch = 0 : i64, scratch_operands = 0 : i64, tpu.core_type = #tpu.core_type<tc>} {
    %c0 = arith.constant 0 : index
    %c0_0 = arith.constant 0 : index
    %c0_1 = arith.constant 0 : index
    %0 = vector.load %arg0[%c0, %c0_0, %c0_1] : memref<2x8x256xf32, #tpu.memory_space<vmem>>, vector<2x8x256xf32>
    %c0_2 = arith.constant 0 : index
    %1 = memref.load %arg4[%c0_2] : memref<3xf32, #tpu.memory_space<smem>>
    %c1 = arith.constant 1 : index
    %2 = memref.load %arg4[%c1] : memref<3xf32, #tpu.memory_space<smem>>
    %c2 = arith.constant 2 : index
    %3 = memref.load %arg4[%c2] : memref<3xf32, #tpu.memory_space<smem>>
    %c0_3 = arith.constant 0 : index
    %c0_4 = arith.constant 0 : index
    %4 = vector.load %arg3[%c0_3, %c0_4] : memref<9x5xf32, #tpu.memory_space<vmem>>, vector<8x2xf32>
    %c0_5 = arith.constant 0 : index
    %c2_6 = arith.constant 2 : index
    %5 = vector.load %arg3[%c0_5, %c2_6] : memref<9x5xf32, #tpu.memory_space<vmem>>, vector<8x2xf32>
    %c0_7 = arith.constant 0 : index
    %c4 = arith.constant 4 : index
    %6 = vector.load %arg3[%c0_7, %c4] : memref<9x5xf32, #tpu.memory_space<vmem>>, vector<8x1xf32>
    %c8 = arith.constant 8 : index
    %c0_8 = arith.constant 0 : index
    %7 = vector.load %arg3[%c8, %c0_8] : memref<9x5xf32, #tpu.memory_space<vmem>>, vector<1x2xf32>
    %cst = arith.constant dense<0.000000e+00> : vector<2x8xf32>
    %8 = vector.multi_reduction <add>, %0, %cst [2] : vector<2x8x256xf32> to vector<2x8xf32>
    %9 = vector.shape_cast %8 : vector<2x8xf32> to vector<2x8x1xf32>
    %cst_9 = arith.constant 3.906250e-03 : f32
    %10 = vector.broadcast %cst_9 : f32 to vector<2x8x1xf32>
    %11 = arith.mulf %9, %10 : vector<2x8x1xf32>
    %12 = vector.shape_cast %4 : vector<8x2xf32> to vector<1x8x2xf32>
    %13 = vector.broadcast %11 : vector<2x8x1xf32> to vector<2x8x2xf32>
    %14 = vector.broadcast %12 : vector<1x8x2xf32> to vector<2x8x2xf32>
    %15 = arith.mulf %13, %14 : vector<2x8x2xf32>
    %cst_10 = arith.constant dense<0.000000e+00> : vector<2x2xf32>
    %16 = vector.multi_reduction <add>, %15, %cst_10 [1] : vector<2x8x2xf32> to vector<2x2xf32>
    %17 = vector.shape_cast %16 : vector<2x2xf32> to vector<2x1x2xf32>
    %18 = vector.shape_cast %7 : vector<1x2xf32> to vector<1x1x2xf32>
    %19 = vector.broadcast %18 : vector<1x1x2xf32> to vector<2x1x2xf32>
    %20 = arith.addf %17, %19 : vector<2x1x2xf32>
    %cst_11 = arith.constant 0.000000e+00 : f32
    %21 = vector.broadcast %cst_11 : f32 to vector<2x1x2xf32>
    %22 = arith.maximumf %20, %21 : vector<2x1x2xf32>
    %23 = vector.shape_cast %5 : vector<8x2xf32> to vector<1x8x2xf32>
    %24 = vector.broadcast %22 : vector<2x1x2xf32> to vector<2x8x2xf32>
    %25 = vector.broadcast %23 : vector<1x8x2xf32> to vector<2x8x2xf32>
    %26 = arith.mulf %24, %25 : vector<2x8x2xf32>
    %cst_12 = arith.constant dense<0.000000e+00> : vector<2x8xf32>
    %27 = vector.multi_reduction <add>, %26, %cst_12 [2] : vector<2x8x2xf32> to vector<2x8xf32>
    %28 = vector.shape_cast %27 : vector<2x8xf32> to vector<2x8x1xf32>
    %29 = vector.shape_cast %6 : vector<8x1xf32> to vector<1x8x1xf32>
    %30 = vector.broadcast %29 : vector<1x8x1xf32> to vector<2x8x1xf32>
    %31 = arith.addf %28, %30 : vector<2x8x1xf32>
    %cst_13 = arith.constant 5.000000e-01 : f32
    %32 = vector.broadcast %cst_13 : f32 to vector<2x8x1xf32>
    %33 = arith.mulf %32, %31 : vector<2x8x1xf32>
    %34 = math.tanh %33 : vector<2x8x1xf32>
    %cst_14 = arith.constant 1.000000e+00 : f32
    %35 = vector.broadcast %cst_14 : f32 to vector<2x8x1xf32>
    %36 = arith.addf %34, %35 : vector<2x8x1xf32>
    %cst_15 = arith.constant 5.000000e-01 : f32
    %37 = vector.broadcast %cst_15 : f32 to vector<2x8x1xf32>
    %38 = arith.mulf %37, %36 : vector<2x8x1xf32>
    %c0_16 = arith.constant 0 : index
    %c0_17 = arith.constant 0 : index
    %c0_18 = arith.constant 0 : index
    %39 = vector.load %arg2[%c0_16, %c0_17, %c0_18] : memref<9x8x1xf32, #tpu.memory_space<vmem>>, vector<1x8x1xf32>
    %40 = vector.shape_cast %39 : vector<1x8x1xf32> to vector<8x1xf32>
    %41 = vector.shape_cast %40 : vector<8x1xf32> to vector<1x8x1xf32>
    %42 = vector.broadcast %41 : vector<1x8x1xf32> to vector<2x8x256xf32>
    %43 = arith.mulf %0, %42 : vector<2x8x256xf32>
    %cst_19 = arith.constant dense<0.000000e+00> : vector<2x256xf32>
    %44 = vector.multi_reduction <add>, %43, %cst_19 [1] : vector<2x8x256xf32> to vector<2x256xf32>
    %45 = vector.shape_cast %44 : vector<2x256xf32> to vector<2x1x256xf32>
    %c17_i32 = arith.constant 17 : i32
    %46 = tpu.dynamic_rotate %45 by %c17_i32 dim 2 : vector<2x1x256xf32>, i32 -> vector<2x1x256xf32>
    %c0_20 = arith.constant 0 : index
    %c0_21 = arith.constant 0 : index
    %c0_22 = arith.constant 0 : index
    %47 = vector.load %arg1[%c0_20, %c0_21, %c0_22] : memref<9x1x256xf32, #tpu.memory_space<vmem>>, vector<1x1x256xf32>
    %48 = vector.shape_cast %47 : vector<1x1x256xf32> to vector<1x256xf32>
    %49 = vector.shape_cast %48 : vector<1x256xf32> to vector<1x1x256xf32>
    %50 = vector.broadcast %49 : vector<1x1x256xf32> to vector<2x1x256xf32>
    %51 = arith.mulf %46, %50 : vector<2x1x256xf32>
    %c1_23 = arith.constant 1 : index
    %c0_24 = arith.constant 0 : index
    %c0_25 = arith.constant 0 : index
    %52 = vector.load %arg2[%c1_23, %c0_24, %c0_25] : memref<9x8x1xf32, #tpu.memory_space<vmem>>, vector<1x8x1xf32>
    %53 = vector.shape_cast %52 : vector<1x8x1xf32> to vector<8x1xf32>
    %54 = vector.shape_cast %53 : vector<8x1xf32> to vector<1x8x1xf32>
    %55 = vector.broadcast %54 : vector<1x8x1xf32> to vector<2x8x256xf32>
    %56 = arith.mulf %0, %55 : vector<2x8x256xf32>
    %cst_26 = arith.constant dense<0.000000e+00> : vector<2x256xf32>
    %57 = vector.multi_reduction <add>, %56, %cst_26 [1] : vector<2x8x256xf32> to vector<2x256xf32>
    %58 = vector.shape_cast %57 : vector<2x256xf32> to vector<2x1x256xf32>
    %c16_i32 = arith.constant 16 : i32
    %59 = tpu.dynamic_rotate %58 by %c16_i32 dim 2 : vector<2x1x256xf32>, i32 -> vector<2x1x256xf32>
    %c1_27 = arith.constant 1 : index
    %c0_28 = arith.constant 0 : index
    %c0_29 = arith.constant 0 : index
    %60 = vector.load %arg1[%c1_27, %c0_28, %c0_29] : memref<9x1x256xf32, #tpu.memory_space<vmem>>, vector<1x1x256xf32>
    %61 = vector.shape_cast %60 : vector<1x1x256xf32> to vector<1x256xf32>
    %62 = vector.shape_cast %61 : vector<1x256xf32> to vector<1x1x256xf32>
    %63 = vector.broadcast %62 : vector<1x1x256xf32> to vector<2x1x256xf32>
    %64 = arith.mulf %59, %63 : vector<2x1x256xf32>
    %65 = arith.addf %51, %64 : vector<2x1x256xf32>
    %c2_30 = arith.constant 2 : index
    %c0_31 = arith.constant 0 : index
    %c0_32 = arith.constant 0 : index
    %66 = vector.load %arg2[%c2_30, %c0_31, %c0_32] : memref<9x8x1xf32, #tpu.memory_space<vmem>>, vector<1x8x1xf32>
    %67 = vector.shape_cast %66 : vector<1x8x1xf32> to vector<8x1xf32>
    %68 = vector.shape_cast %67 : vector<8x1xf32> to vector<1x8x1xf32>
    %69 = vector.broadcast %68 : vector<1x8x1xf32> to vector<2x8x256xf32>
    %70 = arith.mulf %0, %69 : vector<2x8x256xf32>
    %cst_33 = arith.constant dense<0.000000e+00> : vector<2x256xf32>
    %71 = vector.multi_reduction <add>, %70, %cst_33 [1] : vector<2x8x256xf32> to vector<2x256xf32>
    %72 = vector.shape_cast %71 : vector<2x256xf32> to vector<2x1x256xf32>
    %c15_i32 = arith.constant 15 : i32
    %73 = tpu.dynamic_rotate %72 by %c15_i32 dim 2 : vector<2x1x256xf32>, i32 -> vector<2x1x256xf32>
    %c2_34 = arith.constant 2 : index
    %c0_35 = arith.constant 0 : index
    %c0_36 = arith.constant 0 : index
    %74 = vector.load %arg1[%c2_34, %c0_35, %c0_36] : memref<9x1x256xf32, #tpu.memory_space<vmem>>, vector<1x1x256xf32>
    %75 = vector.shape_cast %74 : vector<1x1x256xf32> to vector<1x256xf32>
    %76 = vector.shape_cast %75 : vector<1x256xf32> to vector<1x1x256xf32>
    %77 = vector.broadcast %76 : vector<1x1x256xf32> to vector<2x1x256xf32>
    %78 = arith.mulf %73, %77 : vector<2x1x256xf32>
    %79 = arith.addf %65, %78 : vector<2x1x256xf32>
    %c3 = arith.constant 3 : index
    %c0_37 = arith.constant 0 : index
    %c0_38 = arith.constant 0 : index
    %80 = vector.load %arg2[%c3, %c0_37, %c0_38] : memref<9x8x1xf32, #tpu.memory_space<vmem>>, vector<1x8x1xf32>
    %81 = vector.shape_cast %80 : vector<1x8x1xf32> to vector<8x1xf32>
    %82 = vector.shape_cast %81 : vector<8x1xf32> to vector<1x8x1xf32>
    %83 = vector.broadcast %82 : vector<1x8x1xf32> to vector<2x8x256xf32>
    %84 = arith.mulf %0, %83 : vector<2x8x256xf32>
    %cst_39 = arith.constant dense<0.000000e+00> : vector<2x256xf32>
    %85 = vector.multi_reduction <add>, %84, %cst_39 [1] : vector<2x8x256xf32> to vector<2x256xf32>
    %86 = vector.shape_cast %85 : vector<2x256xf32> to vector<2x1x256xf32>
    %c1_i32 = arith.constant 1 : i32
    %87 = tpu.dynamic_rotate %86 by %c1_i32 dim 2 : vector<2x1x256xf32>, i32 -> vector<2x1x256xf32>
    %c3_40 = arith.constant 3 : index
    %c0_41 = arith.constant 0 : index
    %c0_42 = arith.constant 0 : index
    %88 = vector.load %arg1[%c3_40, %c0_41, %c0_42] : memref<9x1x256xf32, #tpu.memory_space<vmem>>, vector<1x1x256xf32>
    %89 = vector.shape_cast %88 : vector<1x1x256xf32> to vector<1x256xf32>
    %90 = vector.shape_cast %89 : vector<1x256xf32> to vector<1x1x256xf32>
    %91 = vector.broadcast %90 : vector<1x1x256xf32> to vector<2x1x256xf32>
    %92 = arith.mulf %87, %91 : vector<2x1x256xf32>
    %93 = arith.addf %79, %92 : vector<2x1x256xf32>
    %c4_43 = arith.constant 4 : index
    %c0_44 = arith.constant 0 : index
    %c0_45 = arith.constant 0 : index
    %94 = vector.load %arg2[%c4_43, %c0_44, %c0_45] : memref<9x8x1xf32, #tpu.memory_space<vmem>>, vector<1x8x1xf32>
    %95 = vector.shape_cast %94 : vector<1x8x1xf32> to vector<8x1xf32>
    %96 = vector.shape_cast %95 : vector<8x1xf32> to vector<1x8x1xf32>
    %97 = vector.broadcast %96 : vector<1x8x1xf32> to vector<2x8x256xf32>
    %98 = arith.mulf %0, %97 : vector<2x8x256xf32>
    %cst_46 = arith.constant dense<0.000000e+00> : vector<2x256xf32>
    %99 = vector.multi_reduction <add>, %98, %cst_46 [1] : vector<2x8x256xf32> to vector<2x256xf32>
    %100 = vector.shape_cast %99 : vector<2x256xf32> to vector<2x1x256xf32>
    %c4_47 = arith.constant 4 : index
    %c0_48 = arith.constant 0 : index
    %c0_49 = arith.constant 0 : index
    %101 = vector.load %arg1[%c4_47, %c0_48, %c0_49] : memref<9x1x256xf32, #tpu.memory_space<vmem>>, vector<1x1x256xf32>
    %102 = vector.shape_cast %101 : vector<1x1x256xf32> to vector<1x256xf32>
    %103 = vector.shape_cast %102 : vector<1x256xf32> to vector<1x1x256xf32>
    %104 = vector.broadcast %103 : vector<1x1x256xf32> to vector<2x1x256xf32>
    %105 = arith.mulf %100, %104 : vector<2x1x256xf32>
    %106 = arith.addf %93, %105 : vector<2x1x256xf32>
    %c5 = arith.constant 5 : index
    %c0_50 = arith.constant 0 : index
    %c0_51 = arith.constant 0 : index
    %107 = vector.load %arg2[%c5, %c0_50, %c0_51] : memref<9x8x1xf32, #tpu.memory_space<vmem>>, vector<1x8x1xf32>
    %108 = vector.shape_cast %107 : vector<1x8x1xf32> to vector<8x1xf32>
    %109 = vector.shape_cast %108 : vector<8x1xf32> to vector<1x8x1xf32>
    %110 = vector.broadcast %109 : vector<1x8x1xf32> to vector<2x8x256xf32>
    %111 = arith.mulf %0, %110 : vector<2x8x256xf32>
    %cst_52 = arith.constant dense<0.000000e+00> : vector<2x256xf32>
    %112 = vector.multi_reduction <add>, %111, %cst_52 [1] : vector<2x8x256xf32> to vector<2x256xf32>
    %113 = vector.shape_cast %112 : vector<2x256xf32> to vector<2x1x256xf32>
    %c255_i32 = arith.constant 255 : i32
    %114 = tpu.dynamic_rotate %113 by %c255_i32 dim 2 : vector<2x1x256xf32>, i32 -> vector<2x1x256xf32>
    %c5_53 = arith.constant 5 : index
    %c0_54 = arith.constant 0 : index
    %c0_55 = arith.constant 0 : index
    %115 = vector.load %arg1[%c5_53, %c0_54, %c0_55] : memref<9x1x256xf32, #tpu.memory_space<vmem>>, vector<1x1x256xf32>
    %116 = vector.shape_cast %115 : vector<1x1x256xf32> to vector<1x256xf32>
    %117 = vector.shape_cast %116 : vector<1x256xf32> to vector<1x1x256xf32>
    %118 = vector.broadcast %117 : vector<1x1x256xf32> to vector<2x1x256xf32>
    %119 = arith.mulf %114, %118 : vector<2x1x256xf32>
    %120 = arith.addf %106, %119 : vector<2x1x256xf32>
    %c6 = arith.constant 6 : index
    %c0_56 = arith.constant 0 : index
    %c0_57 = arith.constant 0 : index
    %121 = vector.load %arg2[%c6, %c0_56, %c0_57] : memref<9x8x1xf32, #tpu.memory_space<vmem>>, vector<1x8x1xf32>
    %122 = vector.shape_cast %121 : vector<1x8x1xf32> to vector<8x1xf32>
    %123 = vector.shape_cast %122 : vector<8x1xf32> to vector<1x8x1xf32>
    %124 = vector.broadcast %123 : vector<1x8x1xf32> to vector<2x8x256xf32>
    %125 = arith.mulf %0, %124 : vector<2x8x256xf32>
    %cst_58 = arith.constant dense<0.000000e+00> : vector<2x256xf32>
    %126 = vector.multi_reduction <add>, %125, %cst_58 [1] : vector<2x8x256xf32> to vector<2x256xf32>
    %127 = vector.shape_cast %126 : vector<2x256xf32> to vector<2x1x256xf32>
    %c241_i32 = arith.constant 241 : i32
    %128 = tpu.dynamic_rotate %127 by %c241_i32 dim 2 : vector<2x1x256xf32>, i32 -> vector<2x1x256xf32>
    %c6_59 = arith.constant 6 : index
    %c0_60 = arith.constant 0 : index
    %c0_61 = arith.constant 0 : index
    %129 = vector.load %arg1[%c6_59, %c0_60, %c0_61] : memref<9x1x256xf32, #tpu.memory_space<vmem>>, vector<1x1x256xf32>
    %130 = vector.shape_cast %129 : vector<1x1x256xf32> to vector<1x256xf32>
    %131 = vector.shape_cast %130 : vector<1x256xf32> to vector<1x1x256xf32>
    %132 = vector.broadcast %131 : vector<1x1x256xf32> to vector<2x1x256xf32>
    %133 = arith.mulf %128, %132 : vector<2x1x256xf32>
    %134 = arith.addf %120, %133 : vector<2x1x256xf32>
    %c7 = arith.constant 7 : index
    %c0_62 = arith.constant 0 : index
    %c0_63 = arith.constant 0 : index
    %135 = vector.load %arg2[%c7, %c0_62, %c0_63] : memref<9x8x1xf32, #tpu.memory_space<vmem>>, vector<1x8x1xf32>
    %136 = vector.shape_cast %135 : vector<1x8x1xf32> to vector<8x1xf32>
    %137 = vector.shape_cast %136 : vector<8x1xf32> to vector<1x8x1xf32>
    %138 = vector.broadcast %137 : vector<1x8x1xf32> to vector<2x8x256xf32>
    %139 = arith.mulf %0, %138 : vector<2x8x256xf32>
    %cst_64 = arith.constant dense<0.000000e+00> : vector<2x256xf32>
    %140 = vector.multi_reduction <add>, %139, %cst_64 [1] : vector<2x8x256xf32> to vector<2x256xf32>
    %141 = vector.shape_cast %140 : vector<2x256xf32> to vector<2x1x256xf32>
    %c240_i32 = arith.constant 240 : i32
    %142 = tpu.dynamic_rotate %141 by %c240_i32 dim 2 : vector<2x1x256xf32>, i32 -> vector<2x1x256xf32>
    %c7_65 = arith.constant 7 : index
    %c0_66 = arith.constant 0 : index
    %c0_67 = arith.constant 0 : index
    %143 = vector.load %arg1[%c7_65, %c0_66, %c0_67] : memref<9x1x256xf32, #tpu.memory_space<vmem>>, vector<1x1x256xf32>
    %144 = vector.shape_cast %143 : vector<1x1x256xf32> to vector<1x256xf32>
    %145 = vector.shape_cast %144 : vector<1x256xf32> to vector<1x1x256xf32>
    %146 = vector.broadcast %145 : vector<1x1x256xf32> to vector<2x1x256xf32>
    %147 = arith.mulf %142, %146 : vector<2x1x256xf32>
    %148 = arith.addf %134, %147 : vector<2x1x256xf32>
    %c8_68 = arith.constant 8 : index
    %c0_69 = arith.constant 0 : index
    %c0_70 = arith.constant 0 : index
    %149 = vector.load %arg2[%c8_68, %c0_69, %c0_70] : memref<9x8x1xf32, #tpu.memory_space<vmem>>, vector<1x8x1xf32>
    %150 = vector.shape_cast %149 : vector<1x8x1xf32> to vector<8x1xf32>
    %151 = vector.shape_cast %150 : vector<8x1xf32> to vector<1x8x1xf32>
    %152 = vector.broadcast %151 : vector<1x8x1xf32> to vector<2x8x256xf32>
    %153 = arith.mulf %0, %152 : vector<2x8x256xf32>
    %cst_71 = arith.constant dense<0.000000e+00> : vector<2x256xf32>
    %154 = vector.multi_reduction <add>, %153, %cst_71 [1] : vector<2x8x256xf32> to vector<2x256xf32>
    %155 = vector.shape_cast %154 : vector<2x256xf32> to vector<2x1x256xf32>
    %c239_i32 = arith.constant 239 : i32
    %156 = tpu.dynamic_rotate %155 by %c239_i32 dim 2 : vector<2x1x256xf32>, i32 -> vector<2x1x256xf32>
    %c8_72 = arith.constant 8 : index
    %c0_73 = arith.constant 0 : index
    %c0_74 = arith.constant 0 : index
    %157 = vector.load %arg1[%c8_72, %c0_73, %c0_74] : memref<9x1x256xf32, #tpu.memory_space<vmem>>, vector<1x1x256xf32>
    %158 = vector.shape_cast %157 : vector<1x1x256xf32> to vector<1x256xf32>
    %159 = vector.shape_cast %158 : vector<1x256xf32> to vector<1x1x256xf32>
    %160 = vector.broadcast %159 : vector<1x1x256xf32> to vector<2x1x256xf32>
    %161 = arith.mulf %156, %160 : vector<2x1x256xf32>
    %162 = arith.addf %148, %161 : vector<2x1x256xf32>
    %163 = vector.broadcast %3 : f32 to vector<2x1x256xf32>
    %164 = arith.addf %162, %163 : vector<2x1x256xf32>
    %cst_75 = arith.constant 5.000000e-01 : f32
    %165 = vector.broadcast %cst_75 : f32 to vector<2x1x256xf32>
    %166 = arith.mulf %165, %164 : vector<2x1x256xf32>
    %167 = math.tanh %166 : vector<2x1x256xf32>
    %cst_76 = arith.constant 1.000000e+00 : f32
    %168 = vector.broadcast %cst_76 : f32 to vector<2x1x256xf32>
    %169 = arith.addf %167, %168 : vector<2x1x256xf32>
    %cst_77 = arith.constant 5.000000e-01 : f32
    %170 = vector.broadcast %cst_77 : f32 to vector<2x1x256xf32>
    %171 = arith.mulf %170, %169 : vector<2x1x256xf32>
    %172 = vector.broadcast %1 : f32 to vector<2x8x1xf32>
    %173 = arith.mulf %172, %38 : vector<2x8x1xf32>
    %174 = vector.broadcast %2 : f32 to vector<2x1x256xf32>
    %175 = arith.mulf %174, %171 : vector<2x1x256xf32>
    %176 = vector.broadcast %173 : vector<2x8x1xf32> to vector<2x8x256xf32>
    %177 = vector.broadcast %175 : vector<2x1x256xf32> to vector<2x8x256xf32>
    %178 = arith.addf %176, %177 : vector<2x8x256xf32>
    %179 = arith.mulf %0, %178 : vector<2x8x256xf32>
    %c0_78 = arith.constant 0 : index
    %c0_79 = arith.constant 0 : index
    %c0_80 = arith.constant 0 : index
    %180 = vector.load %arg5[%c0_78, %c0_79, %c0_80] : memref<2x8x256xf32, #tpu.memory_space<vmem>>, vector<2x8x256xf32>
    tpu.vector_store %arg5[%c0_78, %c0_79, %c0_80], %179 {strides = array<i32>} : memref<2x8x256xf32, #tpu.memory_space<vmem>>, vector<2x8x256xf32>,
    return
  }
}

</mosaic_0001>

<bundles_post_ra>
// kernel: tpu_custom_call.1
= control target key start
LH: loop header
LB: loop body
LE: loop exit
PB: predicated region body
PF: predicated region fallthrough
CT: control target
= control target key end

     0   :  { %10 = vsyncpa [#allocation4], 0  ;;  %s1298_s0 = inlined_call_operand.vmem [shape: f32[2,8,256], index: 0, kind: input, shape index: {}]   ;;  %s1299_s1 = inlined_call_operand.vmem [shape: f32[9,1,256], index: 1, kind: input, shape index: {}]   ;;  %s1300_s2 = inlined_call_operand.vmem [shape: f32[9,8,1], index: 2, kind: input, shape index: {}]   ;;  %s1301_s3 = inlined_call_operand.vmem [shape: f32[9,5], index: 3, kind: input, shape index: {}]   ;;  %s1302_s4 = inlined_call_operand.vmem [shape: f32[3], index: 4, kind: input, shape index: {}]   ;;  %s1303_s5 = inlined_call_operand.hbm [shape: f32[2,8,256], index: 5, kind: output, shape index: {}]  }
   0x1   :  { %11 = vsyncpa [#allocation3], 0  ;;  %s26_s20 = sshll.u32 %s1302_s4, 4  ;;  %s27_s20 = int_to_ptr.vmem [resolvable:$true] %s26_s20 }
   0x2   :  { %s842_s21 = scalar_lea.vmem %s27_s20, 16  ;;  %p847_p1 = scmp.lt.s32.totalorder %s27_s20, %s27_s20 }
   0x3   :  { %p843_p0 = scmp.ne.s32.totalorder %s27_s20, %s842_s21  ;;  %p848_p2 = scmp.lt.s32.totalorder %s842_s21, %s842_s21 }
   0x5   :  { %p849_p3 = por %p848_p2, %p847_p1 }
   0x7   :  { %p850_p4 = pnand %p849_p3, %p843_p0 }
   0x9   :  { %853 = shalt.err (!%p850_p4)
}
   0xa   :  { %s878_s22 = smov [#allocation2]  }
   0xb   :  { %29 = dma.vmem_to_smem %s27_s20, 16, %s878_s22, [#allocation4]  }
   0xc   :  { %874 = dma.done.wait [#allocation4], 16  }
   0xd   :  { %875 = vsyncadd [#allocation4], 4294967280 }
   0xe   :  { %33 = sfence }
   0xf   :  { %v928_v0 = vld [vmem:[%s1301_s3] sm:$0xff]  ;;  %v938_v2 = vld [vmem:[%s1298_s0 + $0x8] sm:$0xff]  ;;  %s879_s28 = smov 126   ;;  %v946_v4 = vld [vmem:[%s1298_s0 + $0x10] sm:$0xff]  ;;  %v880_v6 = vmov 0   ;;  %vm53_vm0 = vcmask 15360  }
  0x10   :  { %v933_v1 = vld [vmem:[%s1298_s0] sm:$0xff]  ;;  %81 = vrot.lane.b32.xlu1 %v928_v0, %s879_s28  ;;  %v951_v5 = vld [vmem:[%s1298_s0 + $0x18] sm:$0xff]  ;;  %823 = vset.pattern.permute.xlu0 %v880_v6  ;;  %v794_v9 = vld [vmem:[%s1300_s2 + $0x10] sm:$0xff]  ;;  %s882_s4 = smov 16   ;;  %s883_s26 = smov 15  }
  0x11   :  { %v43_v3 = vadd.f32 %v938_v2, %v933_v1  ;;  %822 = vset.pattern.permute.xlu1 %v880_v6  ;;  %v102_v7 = vld [vmem:[%s1300_s2] sm:$0xff]  ;;  %v46_v8 = vadd.f32 %v951_v5, %v946_v4  ;;  %v796_v10 = vld [vmem:[%s1300_s2 + $0x18] sm:$0xff]  ;;  %v800_v11 = vld [vmem:[%s1300_s2 + $0x28] sm:$0xff]  ;;  %s885_s29 = smov 127   ;;  %s886_s30 = smov 113  }
  0x12   :  { %v802_v12 = vld [vmem:[%s1300_s2 + $0x30] sm:$0xff]  ;;  %v804_v13 = vld [vmem:[%s1300_s2 + $0x38] sm:$0xff]  ;;  %v806_v14 = vld [vmem:[%s1300_s2 + $0x40] sm:$0xff]  ;;  %s888_s6 = smov 112   ;;  %s889_s9 = smov 111  }
  0x13   :  { %44 = vadd.xlane.f32.xlu0 %v43_v3  ;;  %v792_v15 = vld [vmem:[%s1300_s2 + $0x8] sm:$0xff]  ;;  %v798_v16 = vld [vmem:[%s1300_s2 + $0x20] sm:$0xff]  ;;  %s881_s2 = smov 17   ;;  %s1131_s18 = sld [smem:[#allocation2]] }
  0x14   :  { %105 = vperm.xlu1 %822, %v102_v7  }
  0x17   :  { %47 = vadd.xlane.f32.xlu0 %v46_v8 }
  0x18   :  { %240 = vperm.xlu1 %822, %v794_v9  }
  0x1c   :  { %309 = vperm.xlu1 %822, %v796_v10  }
  0x20   :  { %434 = vperm.xlu1 %822, %v800_v11  }
  0x24   :  { %503 = vperm.xlu1 %822, %v802_v12  }
  0x28   :  { %572 = vperm.xlu1 %822, %v804_v13  }
  0x2c   :  { %641 = vperm.xlu1 %822, %v806_v14  }
  0x2d   :  { %171 = vperm.xlu0 %823, %v792_v15  }
  0x30   :  { %378 = vperm.xlu1 %822, %v798_v16  }
  0x82   :  { %v982_v17 = vpop.permute.xlu1 %81 }
  0x8f   :  { %v106_v18 = vpop.permute.xlu1 %105 }
  0x90   :  { %v108_v19 = vmul.f32 %v106_v18, %v933_v1  ;;  %v109_v20 = vmul.f32 %v106_v18, %v938_v2  ;;  %v110_v21 = vmul.f32 %v106_v18, %v946_v4  ;;  %v111_v27 = vmul.f32 %v106_v18, %v951_v5 }
  0x92   :  { %v118_v22 = vrot.slane %v109_v20, 4  ;;  %v124_v23 = vrot.slane %v110_v21, 4  ;;  %v112_v24 = vrot.slane %v108_v19, 4  ;;  %v130_v31 = vrot.slane %v111_v27, 4 }
  0x93   :  { %v988_v46 = vpop.permute.xlu1 %240 }
  0x94   :  { %v119_v25 = vadd.f32 %v118_v22, %v109_v20  ;;  %v125_v26 = vadd.f32 %v124_v23, %v110_v21  ;;  %v113_v30 = vadd.f32 %v112_v24, %v108_v19  ;;  %v131_v35 = vadd.f32 %v130_v31, %v111_v27 }
  0x95   :  { %v243_v47 = vmul.f32 %v988_v46, %v933_v1  ;;  %v245_v58 = vmul.f32 %v988_v46, %v946_v4 }
  0x96   :  { %v126_v28 = vrot.slane %v125_v26, 2  ;;  %v120_v29 = vrot.slane %v119_v25, 2  ;;  %v114_v34 = vrot.slane %v113_v30, 2  ;;  %v132_v41 = vrot.slane %v131_v35, 2 }
  0x97   :  { %v247_v53 = vrot.slane %v243_v47, 4  ;;  %v259_v8 = vrot.slane %v245_v58, 4 }
  0x98   :  { %v127_v32 = vadd.f32 %v126_v28, %v125_v26  ;;  %v121_v33 = vadd.f32 %v120_v29, %v119_v25  ;;  %v115_v40 = vadd.f32 %v114_v34, %v113_v30  ;;  %v133_v45 = vadd.f32 %v132_v41, %v131_v35 }
  0x99   :  { %v248_v62 = vadd.f32 %v247_v53, %v243_v47  ;;  %v260_v19 = vadd.f32 %v259_v8, %v245_v58 }
  0x9a   :  { %v128_v36 = vrot.slane %v127_v32, 1  ;;  %v122_v38 = vrot.slane %v121_v33, 1  ;;  %v116_v43 = vrot.slane %v115_v40, 1  ;;  %v134_v50 = vrot.slane %v133_v45, 1 }
  0x9b   :  { %v249_v14 = vrot.slane %v248_v62, 2 }
  0x9c   :  { %v45_v37 = vpop.xlane.xlu0 %44  ;;  %v129_v39 = vadd.f32 %v128_v36, %v127_v32  ;;  %v123_v42 = vadd.f32 %v122_v38, %v121_v33  ;;  %v117_v48 = vadd.f32 %v116_v43, %v115_v40  ;;  %v135_v52 = vadd.f32 %v134_v50, %v133_v45 }
  0x9d   :  { %v250_v20 = vadd.f32 %v249_v14, %v248_v62  ;;  %v49_v22 = vmul.f32 0.00390625, %v45_v37  ;;  %v261_v33 = vrot.slane %v260_v19, 2  ;;  %v244_v62 = vmul.f32 %v988_v46, %v938_v2 }
  0x9e   :  { %138 = vrot.lane.b32.xlu1 %v129_v39, %s881_s2  ;;  %136 = vrot.lane.b32.xlu0 %v117_v48, %s881_s2 }
  0x9f   :  { %v251_v29 = vrot.slane %v250_v20, 1  ;;  %v51_v31 = vmul.f32 %v49_v22, %v928_v0  ;;  %v262_v38 = vadd.f32 %v261_v33, %v260_v19  ;;  %v253_v8 = vrot.slane %v244_v62, 4 }
  0xa0   :  { %v48_v44 = vpop.xlane.xlu0 %47 }
  0xa1   :  { %v50_v49 = vmul.f32 0.00390625, %v48_v44  ;;  %v252_v35 = vadd.f32 %v251_v29, %v250_v20  ;;  %v54_v39 = vsel %vm53_vm0, %v51_v31, 0.0  ;;  %v263_v43 = vrot.slane %v262_v38, 1 }
  0xa2   :  { %140 = vrot.lane.b32.xlu1 %v123_v42, %s881_s2  ;;  %v55_v44 = vrot.slane %v54_v39, 4 }
  0xa3   :  { %v52_v55 = vmul.f32 %v50_v49, %v928_v0  ;;  %v264_v47 = vadd.f32 %v263_v43, %v262_v38 }
  0xa4   :  { %v56_v48 = vadd.f32 %v55_v44, %v54_v39 }
  0xa5   :  { %v61_v3 = vsel %vm53_vm0, %v52_v55, 0.0 }
  0xa6   :  { %142 = vrot.lane.b32.xlu1 %v135_v52, %s881_s2  ;;  %v62_v13 = vrot.slane %v61_v3, 4  ;;  %v57_v50 = vrot.slane %v56_v48, 2  ;;  %v42_v52 = vld [vmem:[%s1301_s3 + $0x8] sm:$0x1]  ;;  %s884_s3 = smov 1  }
  0xa8   :  { %v172_v51 = vpop.permute.xlu0 %171  ;;  %v63_v26 = vadd.f32 %v62_v13, %v61_v3  ;;  %v254_v13 = vadd.f32 %v253_v8, %v244_v62 }
  0xa9   :  { %v174_v54 = vmul.f32 %v172_v51, %v933_v1  ;;  %v175_v56 = vmul.f32 %v172_v51, %v938_v2  ;;  %v176_v57 = vmul.f32 %v172_v51, %v946_v4  ;;  %v177_v59 = vmul.f32 %v172_v51, %v951_v5 }
  0xaa   :  { %v64_v34 = vrot.slane %v63_v26, 2  ;;  %v72_v51 = vlaneseq }
  0xab   :  { %v178_v60 = vrot.slane %v174_v54, 4  ;;  %v184_v61 = vrot.slane %v175_v56, 4  ;;  %v190_v63 = vrot.slane %v176_v57, 4  ;;  %v196_v10 = vrot.slane %v177_v59, 4 }
  0xac   :  { %v65_v41 = vadd.f32 %v64_v34, %v63_v26  ;;  %v1012_v55 = vshrl.u32 %v72_v51, 7 }
  0xad   :  { %v179_v6 = vadd.f32 %v178_v60, %v174_v54  ;;  %v185_v7 = vadd.f32 %v184_v61, %v175_v56  ;;  %v191_v9 = vadd.f32 %v190_v63, %v176_v57  ;;  %v197_v23 = vadd.f32 %v196_v10, %v177_v59  ;;  %v310_v63 = vpop.permute.xlu1 %309 }
  0xae   :  { %v66_v45 = vrot.slane %v65_v41, 1  ;;  %v58_v54 = vadd.f32 %v57_v50, %v56_v48  ;;  %v1015_v58 = vsub.s32 0, %v1012_v55  ;;  %v246_v10 = vmul.f32 %v988_v46, %v951_v5 }
  0xaf   :  { %v186_v11 = vrot.slane %v185_v7, 2  ;;  %v180_v12 = vrot.slane %v179_v6, 2  ;;  %v192_v15 = vrot.slane %v191_v9, 2  ;;  %v198_v32 = vrot.slane %v197_v23, 2 }
  0xb0   :  { %v67_v49 = vadd.f32 %v66_v45, %v65_v41  ;;  %v59_v57 = vrot.slane %v58_v54, 1 }
  0xb1   :  { %v187_v16 = vadd.f32 %v186_v11, %v185_v7  ;;  %v181_v18 = vadd.f32 %v180_v12, %v179_v6  ;;  %v193_v21 = vadd.f32 %v192_v15, %v191_v9  ;;  %v199_v37 = vadd.f32 %v198_v32, %v197_v23  ;;  %v435_v15 = vpop.permute.xlu1 %434 }
  0xb2   :  { %v69_v53 = vadd.f32 %v67_v49, %v42_v52  ;;  %v60_v60 = vadd.f32 %v59_v57, %v58_v54  ;;  %v312_v6 = vmul.f32 %v310_v63, %v933_v1  ;;  %v313_v11 = vmul.f32 %v310_v63, %v938_v2 }
  0xb3   :  { %v188_v24 = vrot.slane %v187_v16, 1  ;;  %v182_v25 = vrot.slane %v181_v18, 1  ;;  %v194_v30 = vrot.slane %v193_v21, 1  ;;  %v200_v40 = vrot.slane %v199_v37, 1 }
  0xb4   :  { %v71_v56 = vmax.f32 %v69_v53, 0.0  ;;  %v68_v3 = vadd.f32 %v60_v60, %v42_v52  ;;  %v316_v12 = vrot.slane %v312_v6, 4  ;;  %v322_v20 = vrot.slane %v313_v11, 4 }
  0xb5   :  { %v189_v27 = vadd.f32 %v188_v24, %v187_v16  ;;  %v183_v28 = vadd.f32 %v182_v25, %v181_v18  ;;  %v195_v36 = vadd.f32 %v194_v30, %v193_v21  ;;  %v201_v42 = vadd.f32 %v200_v40, %v199_v37  ;;  %v504_v30 = vpop.permute.xlu1 %503 }
  0xb6   :  { %v79_v59 = vrot.slane %v71_v56, %v1015_v58  ;;  %v70_v9 = vmax.f32 %v68_v3, 0.0  ;;  %v265_v16 = vrot.slane %v246_v10, 4  ;;  %v314_v18 = vmul.f32 %v310_v63, %v946_v4 }
  0xb7   :  { %206 = vrot.lane.b32.xlu0 %v189_v27, %s882_s4  ;;  %202 = vrot.lane.b32.xlu1 %v183_v28, %s882_s4  ;;  %v317_v19 = vadd.f32 %v316_v12, %v312_v6  ;;  %v437_v21 = vmul.f32 %v435_v15, %v933_v1  ;;  %v255_v23 = vrot.slane %v254_v13, 2  ;;  %v315_v24 = vmul.f32 %v310_v63, %v951_v5 }
  0xb8   :  { %v85_v61 = vmul.f32 %v982_v17, %v79_v59  ;;  %v75_v14 = vrot.slane %v70_v9, %v1015_v58  ;;  %v266_v46 = vadd.f32 %v265_v16, %v246_v10  ;;  %v323_v25 = vadd.f32 %v322_v20, %v313_v11 }
  0xb9   :  { %v328_v26 = vrot.slane %v314_v18, 4  ;;  %v318_v27 = vrot.slane %v317_v19, 2  ;;  %v438_v28 = vmul.f32 %v435_v15, %v938_v2  ;;  %v441_v29 = vrot.slane %v437_v21, 4  ;;  %v573_v48 = vpop.permute.xlu1 %572 }
  0xba   :  { %v89_v7 = vsel %vm53_vm0, %v85_v61, 0.0  ;;  %v84_v22 = vmul.f32 %v982_v17, %v75_v14  ;;  %v256_v32 = vadd.f32 %v255_v23, %v254_v13  ;;  %v334_v33 = vrot.slane %v315_v24, 4 }
  0xbb   :  { %271 = vrot.lane.b32.xlu0 %v252_v35, %s883_s26  ;;  %204 = vrot.lane.b32.xlu1 %v195_v36, %s882_s4  ;;  %v439_v34 = vmul.f32 %v435_v15, %v946_v4  ;;  %v506_v17 = vmul.f32 %v504_v30, %v933_v1  ;;  %v319_v35 = vadd.f32 %v318_v27, %v317_v19  ;;  %v324_v36 = vrot.slane %v323_v25, 2 }
  0xbc   :  { %v86_v31 = vsel %vm53_vm0, %v84_v22, 0.0  ;;  %v267_v37 = vrot.slane %v266_v46, 2  ;;  %v329_v38 = vadd.f32 %v328_v26, %v314_v18  ;;  %v442_v39 = vadd.f32 %v441_v29, %v437_v21 }
  0xbd   :  { %v447_v40 = vrot.slane %v438_v28, 4  ;;  %v257_v41 = vrot.slane %v256_v32, 1  ;;  %v440_v43 = vmul.f32 %v435_v15, %v951_v5  ;;  %v453_v44 = vrot.slane %v439_v34, 4  ;;  %v642_v20 = vpop.permute.xlu1 %641 }
  0xbe   :  { %v507_v45 = vmul.f32 %v504_v30, %v938_v2  ;;  %v320_v49 = vrot.slane %v319_v35, 1  ;;  %v325_v50 = vadd.f32 %v324_v36, %v323_v25  ;;  %v268_v52 = vadd.f32 %v267_v37, %v266_v46 }
  0xbf   :  { %208 = vrot.lane.b32.xlu1 %v201_v42, %s882_s4  ;;  %v335_v42 = vadd.f32 %v334_v33, %v315_v24  ;;  %v448_v53 = vadd.f32 %v447_v40, %v438_v28  ;;  %v258_v54 = vadd.f32 %v257_v41, %v256_v32  ;;  %v443_v56 = vrot.slane %v442_v39, 2 }
  0xc0   :  { %v330_v57 = vrot.slane %v329_v38, 2  ;;  %v508_v59 = vmul.f32 %v504_v30, %v946_v4  ;;  %v454_v60 = vadd.f32 %v453_v44, %v439_v34  ;;  %v459_v61 = vrot.slane %v440_v43, 4 }
  0xc1   :  { %v516_v62 = vrot.slane %v507_v45, 4  ;;  %v575_v63 = vmul.f32 %v573_v48, %v933_v1  ;;  %v321_v6 = vadd.f32 %v320_v49, %v319_v35  ;;  %v269_v8 = vrot.slane %v268_v52, 1 }
  0xc2   :  { %v444_v9 = vadd.f32 %v443_v56, %v442_v39  ;;  %v331_v10 = vadd.f32 %v330_v57, %v329_v38  ;;  %v449_v11 = vrot.slane %v448_v53, 2  ;;  %v336_v12 = vrot.slane %v335_v42, 2 }
  0xc3   :  { %273 = vrot.lane.b32.xlu1 %v264_v47, %s883_s26  ;;  %v510_v47 = vrot.slane %v506_v17, 4  ;;  %v509_v13 = vmul.f32 %v504_v30, %v951_v5  ;;  %v522_v14 = vrot.slane %v508_v59, 4  ;;  %v460_v15 = vadd.f32 %v459_v61, %v440_v43 }
  0xc4   :  { %v517_v16 = vadd.f32 %v516_v62, %v507_v45  ;;  %v576_v18 = vmul.f32 %v573_v48, %v938_v2  ;;  %v579_v19 = vrot.slane %v575_v63, 4  ;;  %v270_v22 = vadd.f32 %v269_v8, %v268_v52 }
  0xc5   :  { %v511_v3 = vadd.f32 %v510_v47, %v506_v17  ;;  %v455_v24 = vrot.slane %v454_v60, 2  ;;  %v445_v46 = vrot.slane %v444_v9, 1  ;;  %v332_v25 = vrot.slane %v331_v10, 1 }
  0xc6   :  { %v450_v26 = vadd.f32 %v449_v11, %v448_v53  ;;  %v337_v27 = vadd.f32 %v336_v12, %v335_v42  ;;  %v523_v28 = vadd.f32 %v522_v14, %v508_v59  ;;  %v528_v29 = vrot.slane %v509_v13, 4 }
  0xc7   :  { %v512_v23 = vrot.slane %v511_v3, 2  ;;  %v577_v30 = vmul.f32 %v573_v48, %v946_v4  ;;  %v585_v32 = vrot.slane %v576_v18, 4  ;;  %v644_v33 = vmul.f32 %v642_v20, %v933_v1 }
  0xc8   :  { %v456_v17 = vadd.f32 %v455_v24, %v454_v60  ;;  %v518_v35 = vrot.slane %v517_v16, 2  ;;  %v461_v36 = vrot.slane %v460_v15, 2  ;;  %v446_v37 = vadd.f32 %v445_v46, %v444_v9 }
  0xc9   :  { %v513_v34 = vadd.f32 %v512_v23, %v511_v3  ;;  %v333_v38 = vadd.f32 %v332_v25, %v331_v10  ;;  %v451_v39 = vrot.slane %v450_v26, 1  ;;  %v338_v40 = vrot.slane %v337_v27, 1 }
  0xca   :  { %v529_v41 = vadd.f32 %v528_v29, %v509_v13  ;;  %v578_v42 = vmul.f32 %v573_v48, %v951_v5  ;;  %v586_v43 = vadd.f32 %v585_v32, %v576_v18  ;;  %v591_v44 = vrot.slane %v577_v30, 4 }
  0xcb   :  { %v645_v45 = vmul.f32 %v642_v20, %v938_v2  ;;  %v648_v47 = vrot.slane %v644_v33, 4  ;;  %v514_v49 = vrot.slane %v513_v34, 1  ;;  %v519_v52 = vadd.f32 %v518_v35, %v517_v16  ;;  %v1059_v35 = vpop.permute.xlu1 %378 }
  0xcc   :  { %v339_v56 = vadd.f32 %v338_v40, %v337_v27  ;;  %v462_v57 = vadd.f32 %v461_v36, %v460_v15  ;;  %v524_v59 = vrot.slane %v523_v28, 2  ;;  %v597_v60 = vrot.slane %v578_v42, 4 }
  0xcd   :  { %v592_v48 = vadd.f32 %v591_v44, %v577_v30  ;;  %v646_v61 = vmul.f32 %v642_v20, %v946_v4  ;;  %v649_v62 = vadd.f32 %v648_v47, %v644_v33  ;;  %v515_v3 = vadd.f32 %v514_v49, %v513_v34 }
  0xce   :  { %v587_v8 = vrot.slane %v586_v43, 2  ;;  %v520_v9 = vrot.slane %v519_v52, 1  ;;  %v463_v10 = vrot.slane %v462_v57, 1  ;;  %v525_v11 = vadd.f32 %v524_v59, %v523_v28 }
  0xcf   :  { %v530_v12 = vrot.slane %v529_v41, 2  ;;  %v598_v13 = vadd.f32 %v597_v60, %v578_v42  ;;  %v647_v14 = vmul.f32 %v642_v20, %v951_v5  ;;  %v660_v16 = vrot.slane %v646_v61, 4 }
  0xd0   :  { %v650_v18 = vrot.slane %v649_v62, 2  ;;  %v521_v23 = vadd.f32 %v520_v9, %v519_v52  ;;  %v464_v24 = vadd.f32 %v463_v10, %v462_v57  ;;  %v526_v46 = vrot.slane %v525_v11, 1 }
  0xd1   :  { %v531_v25 = vadd.f32 %v530_v12, %v529_v41  ;;  %v661_v27 = vadd.f32 %v660_v16, %v646_v61  ;;  %v666_v20 = vrot.slane %v647_v14, 4  ;;  %v1066_v49 = vand.u32 127, %v72_v51 }
  0xd2   :  { %v651_v30 = vadd.f32 %v650_v18, %v649_v62  ;;  %v527_v32 = vadd.f32 %v526_v46, %v525_v11  ;;  %v1072_v57 = vsub.s32 1, %v1012_v55 }
  0xd3   :  { %v532_v33 = vrot.slane %v531_v25, 1  ;;  %v667_v36 = vadd.f32 %v666_v20, %v647_v14  ;;  %vm146_vm1 = vcmp.lt.s32.totalorder %v1066_v49, 17  ;;  %v793_v14 = vld [vmem:[%s1299_s1 + $0x2] sm:$0x3]  ;;  %vm210_vm2 = vcmp.lt.s32.totalorder %v1066_v49, 16 }
  0xd4   :  { %v221_v16 = vrot.slane %v793_v14, %v1015_v58  ;;  %v225_v18 = vrot.slane %v793_v14, %v1072_v57  ;;  %vm279_vm3 = vcmp.lt.s32.totalorder %v1066_v49, 15  ;;  %vm348_vm4 = vcmp.lt.s32.totalorder %v1066_v49, 1 }
  0xd5   :  { %v533_v40 = vadd.f32 %v532_v33, %v531_v25  ;;  %vm473_vm5 = vcmp.lt.s32.totalorder %v1066_v49, 127  ;;  %vm542_vm6 = vcmp.lt.s32.totalorder %v1066_v49, 113  ;;  %vm611_vm7 = vcmp.lt.s32.totalorder %v1066_v49, 112 }
  0xd6   :  { %vm680_vm8 = vcmp.lt.s32.totalorder %v1066_v49, 111 }
  0xda   :  { %90 = vadd.xlane.f32.xlu0 %v89_v7  ;;  %v326_v7 = vrot.slane %v325_v50, 1 }
  0xdc   :  { %v327_v21 = vadd.f32 %v326_v7, %v325_v50  ;;  %v457_v50 = vrot.slane %v456_v17, 1 }
  0xe7   :  { %87 = vadd.xlane.f32.xlu1 %v86_v31  ;;  %v580_v31 = vadd.f32 %v579_v19, %v575_v63  ;;  %v654_v63 = vrot.slane %v645_v45, 4 }
  0xe9   :  { %v581_v53 = vrot.slane %v580_v31, 2  ;;  %v655_v15 = vadd.f32 %v654_v63, %v645_v45 }
  0xeb   :  { %v582_v7 = vadd.f32 %v581_v53, %v580_v31  ;;  %v656_v34 = vrot.slane %v655_v15, 2 }
  0xed   :  { %v583_v19 = vrot.slane %v582_v7, 1  ;;  %v657_v41 = vadd.f32 %v656_v34, %v655_v15 }
  0xef   :  { %v584_v28 = vadd.f32 %v583_v19, %v582_v7  ;;  %v658_v52 = vrot.slane %v657_v41, 1 }
  0xf0   :  { %275 = vrot.lane.b32.xlu0 %v258_v54, %s883_s26  ;;  %v452_v54 = vadd.f32 %v451_v39, %v450_v26  ;;  %v887_v26 = vmov 4  }
  0xf1   :  { %825 = vset.pattern.permute.xlu1 %v887_v26  ;;  %824 = vset.pattern.permute.xlu0 %v887_v26  ;;  %v659_v60 = vadd.f32 %v658_v52, %v657_v41  ;;  %v384_v41 = vmul.f32 %v1059_v35, %v951_v5 }
  0xf4   :  { %340 = vrot.lane.b32.xlu0 %v321_v6, %s884_s3  ;;  %v458_v6 = vadd.f32 %v457_v50, %v456_v17  ;;  %v599_v17 = vrot.slane %v598_v13, 2  ;;  %v151_v50 = vld [vmem:[%s1299_s1] sm:$0x3] }
  0xf5   :  { %v160_v51 = vrot.slane %v151_v50, %v1072_v57  ;;  %v156_v15 = vrot.slane %v151_v50, %v1015_v58  ;;  %v403_v50 = vrot.slane %v384_v41, 4 }
  0xf6   :  { %v600_v42 = vadd.f32 %v599_v17, %v598_v13 }
  0xf8   :  { %344 = vrot.lane.b32.xlu0 %v327_v21, %s884_s3  ;;  %277 = vrot.lane.b32.xlu1 %v270_v22, %s883_s26  ;;  %v588_v21 = vadd.f32 %v587_v8, %v586_v43  ;;  %v593_v22 = vrot.slane %v592_v48, 2  ;;  %v662_v43 = vrot.slane %v661_v27, 2  ;;  %v601_v53 = vrot.slane %v600_v42, 1  ;;  %s790_s26 = sld [smem:[#allocation2 + $0x1]] }
  0xfa   :  { %v589_v29 = vrot.slane %v588_v21, 1  ;;  %v594_v31 = vadd.f32 %v593_v22, %v592_v48  ;;  %v602_v48 = vadd.f32 %v601_v53, %v600_v42 }
  0xfc   :  { %465 = vrot.lane.b32.xlu0 %v446_v37, %s885_s29  ;;  %342 = vrot.lane.b32.xlu1 %v333_v38, %s884_s3  ;;  %v590_v37 = vadd.f32 %v589_v29, %v588_v21  ;;  %v652_v38 = vrot.slane %v651_v30, 1  ;;  %v595_v39 = vrot.slane %v594_v31, 1 }
  0xfe   :  { %v653_v45 = vadd.f32 %v652_v38, %v651_v30  ;;  %v596_v47 = vadd.f32 %v595_v39, %v594_v31 }
 0x100   :  { %469 = vrot.lane.b32.xlu0 %v452_v54, %s885_s29  ;;  %346 = vrot.lane.b32.xlu1 %v339_v56, %s884_s3  ;;  %v663_v54 = vadd.f32 %v662_v43, %v661_v27  ;;  %v668_v56 = vrot.slane %v667_v36, 2 }
 0x102   :  { %v664_v61 = vrot.slane %v663_v54, 1  ;;  %v669_v62 = vadd.f32 %v668_v56, %v667_v36  ;;  %v382_v36 = vmul.f32 %v1059_v35, %v938_v2 }
 0x104   :  { %534 = vrot.lane.b32.xlu0 %v515_v3, %s886_s30  ;;  %467 = vrot.lane.b32.xlu1 %v458_v6, %s885_s29  ;;  %v665_v7 = vadd.f32 %v664_v61, %v663_v54  ;;  %v670_v8 = vrot.slane %v669_v62, 1 }
 0x106   :  { %v671_v13 = vadd.f32 %v670_v8, %v669_v62 }
 0x108   :  { %538 = vrot.lane.b32.xlu0 %v521_v23, %s886_s30  ;;  %471 = vrot.lane.b32.xlu1 %v464_v24, %s885_s29 }
 0x10c   :  { %603 = vrot.lane.b32.xlu0 %v584_v28, %s888_s6  ;;  %536 = vrot.lane.b32.xlu1 %v527_v32, %s886_s30 }
 0x110   :  { %607 = vrot.lane.b32.xlu0 %v590_v37, %s888_s6  ;;  %540 = vrot.lane.b32.xlu1 %v533_v40, %s886_s30  ;;  %v139_v44 = vpop.permute.xlu1 %138  ;;  %v137_v63 = vpop.permute.xlu0 %136  ;;  %v391_v37 = vrot.slane %v382_v36, 4  ;;  %v795_v40 = vld [vmem:[%s1299_s1 + $0x4] sm:$0x3]  ;;  %s890_s30 = smov [#allocation5]  }
 0x111   :  { %v294_v2 = vrot.slane %v795_v40, %v1072_v57 }
 0x112   :  { %v392_v39 = vadd.f32 %v391_v37, %v382_v36 }
 0x114   :  { %672 = vrot.lane.b32.xlu0 %v653_v45, %s889_s9  ;;  %605 = vrot.lane.b32.xlu1 %v596_v47, %s888_s6  ;;  %v141_v59 = vpop.permute.xlu1 %140  ;;  %v393_v43 = vrot.slane %v392_v39, 2  ;;  %v290_v45 = vrot.slane %v795_v40, %v1015_v58 }
 0x115   :  { %v147_v55 = vsel %vm146_vm1, %v137_v63, %v141_v59  ;;  %v149_v3 = vsel %vm146_vm1, %v141_v59, %v137_v63  ;;  %v404_v63 = vadd.f32 %v403_v50, %v384_v41  ;;  %v1170_v41 = vld [vmem:[%s1299_s1 + $0xc] sm:$0x3] }
 0x116   :  { %v164_v6 = vmul.f32 %v160_v51, %v147_v55  ;;  %v163_v24 = vmul.f32 %v156_v15, %v149_v3  ;;  %v394_v53 = vadd.f32 %v393_v43, %v392_v39 }
 0x117   :  { %v405_v8 = vrot.slane %v404_v63, 2 }
 0x118   :  { %676 = vrot.lane.b32.xlu0 %v659_v60, %s889_s9  ;;  %609 = vrot.lane.b32.xlu1 %v602_v48, %s888_s6  ;;  %v143_v9 = vpop.permute.xlu1 %142  ;;  %v395_v62 = vrot.slane %v394_v53, 1  ;;  %s778_s6 = sshll.u32 %s890_s30, 4  ;;  %s779_s6 = int_to_ptr.vmem [resolvable:$true] %s778_s6 }
 0x119   :  { %v148_v10 = vsel %vm146_vm1, %v139_v44, %v143_v9  ;;  %v150_v11 = vsel %vm146_vm1, %v143_v9, %v139_v44  ;;  %s854_s11 = scalar_lea.vmem %s779_s6, 512  ;;  %p859_p6 = scmp.lt.s32.totalorder %s779_s6, %s779_s6 }
 0x11a   :  { %v166_v12 = vmul.f32 %v160_v51, %v148_v10  ;;  %v165_v31 = vmul.f32 %v156_v15, %v150_v11  ;;  %v1115_v51 = vld [vmem:[%s1299_s1 + $0x6] sm:$0x3]  ;;  %v396_v11 = vadd.f32 %v395_v62, %v394_v53  ;;  %v1143_v15 = vld [vmem:[%s1299_s1 + $0xa] sm:$0x3]  ;;  %p855_p5 = scmp.ne.s32.totalorder %s779_s6, %s854_s11  ;;  %p860_p7 = scmp.lt.s32.totalorder %s854_s11, %s854_s11 }
 0x11b   :  { %v363_v3 = vrot.slane %v1115_v51, %v1072_v57 }
 0x11c   :  { %674 = vrot.lane.b32.xlu1 %v665_v7, %s889_s9  ;;  %p861_p8 = por %p860_p7, %p859_p6 }
 0x11e   :  { %p862_p9 = pnand %p861_p8, %p855_p5 }
 0x120   :  { %678 = vrot.lane.b32.xlu1 %v671_v13, %s889_s9 }
 0x129   :  { %v203_v19 = vpop.permute.xlu1 %202  ;;  %v207_v21 = vpop.permute.xlu0 %206 }
 0x12a   :  { %v211_v22 = vsel %vm210_vm2, %v203_v19, %v207_v21  ;;  %v213_v23 = vsel %vm210_vm2, %v207_v21, %v203_v19  ;;  %v406_v21 = vadd.f32 %v405_v8, %v404_v63 }
 0x12b   :  { %v228_v46 = vmul.f32 %v221_v16, %v213_v23  ;;  %v229_v25 = vmul.f32 %v225_v18, %v211_v22 }
 0x12d   :  { %v232_v26 = vadd.f32 %v228_v46, %v163_v24  ;;  %v233_v27 = vadd.f32 %v229_v25, %v164_v6  ;;  %v205_v20 = vpop.permute.xlu1 %204  ;;  %v272_v38 = vpop.permute.xlu0 %271  ;;  %v1127_v6 = vld [vmem:[%s1299_s1 + $0x8] sm:$0x3]  ;;  %v488_v25 = vrot.slane %v1143_v15, %v1072_v57 }
 0x131   :  { %v209_v28 = vpop.permute.xlu1 %208 }
 0x132   :  { %v212_v29 = vsel %vm210_vm2, %v205_v20, %v209_v28  ;;  %v214_v30 = vsel %vm210_vm2, %v209_v28, %v205_v20 }
 0x133   :  { %v230_v32 = vmul.f32 %v221_v16, %v214_v30  ;;  %v231_v33 = vmul.f32 %v225_v18, %v212_v29  ;;  %v727_v30 = vstv %s1131_s18 }
 0x135   :  { %v1093_v34 = vadd.f32 %v230_v32, %v165_v31  ;;  %v1095_v17 = vadd.f32 %v231_v33, %v166_v12  ;;  %v274_v55 = vpop.permute.xlu1 %273  ;;  %v419_v12 = vrot.slane %v1127_v6, %v1072_v57  ;;  %v407_v31 = vrot.slane %v406_v21, 1 }
 0x137   :  { %v423_v23 = vmul.f32 %v419_v12, %v396_v11 }
 0x163   :  { %v91_v42 = vpop.xlane.xlu0 %90 }
 0x164   :  { %v93_v44 = vadd.f32 %v91_v42, %v928_v0 }
 0x166   :  { %v95_v47 = vmul.f32 0.5, %v93_v44 }
 0x167   :  { %v276_v52 = vpop.permute.xlu0 %275 }
 0x168   :  { %826 = vtanh.f32 %v95_v47  ;;  %v280_v54 = vsel %vm279_vm3, %v272_v38, %v276_v52  ;;  %v282_v5 = vsel %vm279_vm3, %v276_v52, %v272_v38 }
 0x169   :  { %v297_v56 = vmul.f32 %v290_v45, %v282_v5  ;;  %v298_v59 = vmul.f32 %v294_v2, %v280_v54 }
 0x16b   :  { %v1117_v60 = vadd.f32 %v297_v56, %v232_v26  ;;  %v302_v48 = vadd.f32 %v298_v59, %v233_v27  ;;  %v1119_v61 = vpop.permute.xlu0 %340 }
 0x16f   :  { %v1129_v7 = vpop.permute.xlu0 %344 }
 0x170   :  { %v349_v9 = vsel %vm348_vm4, %v1119_v61, %v1129_v7  ;;  %v88_v10 = vpop.xlane.xlu1 %87 }
 0x171   :  { %v367_v13 = vmul.f32 %v363_v3, %v349_v9  ;;  %v92_v14 = vadd.f32 %v88_v10, %v928_v0 }
 0x173   :  { %v371_v16 = vadd.f32 %v367_v13, %v302_v48  ;;  %v94_v18 = vmul.f32 0.5, %v92_v14  ;;  %v1145_v19 = vpop.permute.xlu0 %465  ;;  %v1192_v48 = vld [vmem:[%s1299_s1 + $0xe] sm:$0x3] }
 0x174   :  { %v278_v22 = vpop.permute.xlu1 %277  ;;  %v626_v10 = vrot.slane %v1192_v48, %v1072_v57 }
 0x175   :  { %v827_v24 = vpop.eup %826  ;;  %828 = vtanh.f32 %v94_v18  ;;  %v281_v0 = vsel %vm279_vm3, %v274_v55, %v278_v22  ;;  %v283_v46 = vsel %vm279_vm3, %v278_v22, %v274_v55  ;;  %v427_v28 = vadd.f32 %v423_v23, %v371_v16  ;;  %v807_v22 = vld [vmem:[%s1299_s1 + $0x10] sm:$0x3]  ;;  %s791_s1 = sld [smem:[#allocation2 + $0x2]] }
 0x176   :  { %v99_v26 = vadd.f32 1.0, %v827_v24  ;;  %v299_v27 = vmul.f32 %v290_v45, %v283_v46  ;;  %v300_v20 = vmul.f32 %v294_v2, %v281_v0  ;;  %v557_v45 = vrot.slane %v1170_v41, %v1072_v57 }
 0x177   :  { %v1154_v29 = vpop.permute.xlu0 %469 }
 0x178   :  { %v101_v32 = vmul.f32 0.5, %v99_v26  ;;  %v1158_v33 = vadd.f32 %v299_v27, %v1093_v34  ;;  %v304_v36 = vadd.f32 %v300_v20, %v1095_v17  ;;  %v1161_v37 = vpop.permute.xlu1 %342  ;;  %v476_v38 = vsel %vm473_vm5, %v1154_v29, %v1145_v19 }
 0x179   :  { %v492_v39 = vmul.f32 %v488_v25, %v476_v38  ;;  %v408_v17 = vadd.f32 %v407_v31, %v406_v21 }
 0x17a   :  { %v729_v40 = vmul.f32 %v727_v30, %v101_v32 }
 0x17b   :  { %v1172_v42 = vpop.permute.xlu0 %534  ;;  %v496_v34 = vadd.f32 %v492_v39, %v427_v28  ;;  %v425_v54 = vmul.f32 %v419_v12, %v408_v17 }
 0x17c   :  { %v1174_v43 = vpop.permute.xlu1 %346  ;;  %742 = vperm.xlu1 %825, %v729_v40  }
 0x17d   :  { %v350_v44 = vsel %vm348_vm4, %v1161_v37, %v1174_v43 }
 0x17e   :  { %v369_v2 = vmul.f32 %v363_v3, %v350_v44 }
 0x17f   :  { %v1183_v47 = vpop.permute.xlu0 %538 }
 0x180   :  { %v373_v50 = vadd.f32 %v369_v2, %v304_v36  ;;  %v545_v52 = vsel %vm542_vm6, %v1183_v47, %v1172_v42  ;;  %v468_v53 = vpop.permute.xlu1 %467  ;;  %v383_v2 = vmul.f32 %v1059_v35, %v946_v4  ;;  %v415_v4 = vrot.slane %v1127_v6, %v1015_v58 }
 0x181   :  { %v561_v5 = vmul.f32 %v557_v45, %v545_v52 }
 0x182   :  { %v829_v56 = vpop.eup %828  ;;  %v429_v59 = vadd.f32 %v425_v54, %v373_v50  ;;  %v397_v50 = vrot.slane %v383_v2, 4 }
 0x183   :  { %v98_v62 = vadd.f32 1.0, %v829_v56  ;;  %v565_v63 = vadd.f32 %v561_v5, %v496_v34  ;;  %v1194_v55 = vpop.permute.xlu0 %603  ;;  %v381_v5 = vmul.f32 %v1059_v35, %v933_v1  ;;  %v484_v35 = vrot.slane %v1143_v15, %v1015_v58 }
 0x184   :  { %v472_v3 = vpop.permute.xlu1 %471  ;;  %v398_v52 = vadd.f32 %v397_v50, %v383_v2 }
 0x185   :  { %v100_v8 = vmul.f32 0.5, %v98_v62  ;;  %v477_v9 = vsel %vm473_vm5, %v472_v3, %v468_v53  ;;  %v352_v62 = vsel %vm348_vm4, %v1174_v43, %v1161_v37  ;;  %v475_v1 = vsel %vm473_vm5, %v468_v53, %v472_v3 }
 0x186   :  { %v494_v11 = vmul.f32 %v488_v25, %v477_v9  ;;  %v695_v25 = vrot.slane %v807_v22, %v1072_v57  ;;  %v399_v54 = vrot.slane %v398_v52, 2  ;;  %v622_v53 = vrot.slane %v1192_v48, %v1015_v58 }
 0x187   :  { %v1201_v12 = vpop.permute.xlu0 %607  ;;  %v728_v13 = vmul.f32 %v727_v30, %v100_v8  ;;  %v359_v8 = vrot.slane %v1115_v51, %v1015_v58  ;;  %v553_v51 = vrot.slane %v1170_v41, %v1015_v58 }
 0x188   :  { %v498_v14 = vadd.f32 %v494_v11, %v429_v59  ;;  %v614_v16 = vsel %vm611_vm7, %v1201_v12, %v1194_v55  ;;  %v537_v18 = vpop.permute.xlu1 %536  ;;  %v400_v56 = vadd.f32 %v399_v54, %v398_v52  ;;  %v385_v59 = vrot.slane %v381_v5, 4 }
 0x189   :  { %v630_v21 = vmul.f32 %v626_v10, %v614_v16  ;;  %737 = vperm.xlu0 %824, %v728_v13   ;;  %v493_v16 = vmul.f32 %v484_v35, %v475_v1 }
 0x18a   :  { %v386_v9 = vadd.f32 %v385_v59, %v381_v5 }
 0x18b   :  { %v634_v23 = vadd.f32 %v630_v21, %v565_v63  ;;  %v1210_v24 = vpop.permute.xlu0 %672  ;;  %v401_v63 = vrot.slane %v400_v56, 1 }
 0x18c   :  { %v541_v0 = vpop.permute.xlu1 %540  ;;  %v387_v13 = vrot.slane %v386_v9, 2 }
 0x18d   :  { %v546_v46 = vsel %vm542_vm6, %v541_v0, %v537_v18  ;;  %v402_v11 = vadd.f32 %v401_v63, %v400_v56  ;;  %v544_v37 = vsel %vm542_vm6, %v537_v18, %v541_v0  ;;  %v691_v18 = vrot.slane %v807_v22, %v1015_v58 }
 0x18e   :  { %v563_v26 = vmul.f32 %v557_v45, %v546_v46  ;;  %v388_v21 = vadd.f32 %v387_v13, %v386_v9  ;;  %v562_v3 = vmul.f32 %v553_v51, %v544_v37  ;;  %v838_v37 = vld [vmem:[%s1298_s0 + $0x10] sm:$0xff] }
 0x18f   :  { %v1216_v27 = vpop.permute.xlu0 %676  ;;  %v424_v43 = vmul.f32 %v415_v4, %v402_v11 }
 0x190   :  { %v567_v20 = vadd.f32 %v563_v26, %v498_v14  ;;  %v683_v28 = vsel %vm680_vm8, %v1216_v27, %v1210_v24  ;;  %v606_v30 = vpop.permute.xlu1 %605  ;;  %v389_v46 = vrot.slane %v388_v21, 1 }
 0x191   :  { %v699_v31 = vmul.f32 %v695_v25, %v683_v28 }
 0x192   :  { %v390_v48 = vadd.f32 %v389_v46, %v388_v21 }
 0x193   :  { %v1222_v32 = vadd.f32 %v699_v31, %v634_v23 }
 0x194   :  { %v610_v36 = vpop.permute.xlu1 %609 }
 0x195   :  { %v615_v38 = vsel %vm611_vm7, %v610_v36, %v606_v30  ;;  %v613_v6 = vsel %vm611_vm7, %v606_v30, %v610_v36  ;;  %v474_v30 = vsel %vm473_vm5, %v1145_v19, %v1154_v29 }
 0x196   :  { %v632_v39 = vmul.f32 %v626_v10, %v615_v38  ;;  %v368_v10 = vmul.f32 %v359_v8, %v352_v62  ;;  %v631_v0 = vmul.f32 %v622_v53, %v613_v6  ;;  %v491_v22 = vmul.f32 %v484_v35, %v474_v30 }
 0x197   :  { %v706_v38 = vstv %s791_s1  ;;  %v730_v62 = vstv %s790_s26 }
 0x198   :  { %v636_v40 = vadd.f32 %v632_v39, %v567_v20  ;;  %v675_v57 = vpop.permute.xlu1 %674  ;;  %v372_v14 = vadd.f32 %v368_v10, %v1158_v33  ;;  %v351_v33 = vsel %vm348_vm4, %v1129_v7, %v1119_v61  ;;  %v543_v61 = vsel %vm542_vm6, %v1172_v42, %v1183_v47 }
 0x199   :  { %v366_v20 = vmul.f32 %v359_v8, %v351_v33  ;;  %v422_v7 = vmul.f32 %v415_v4, %v390_v48  ;;  %v612_v39 = vsel %vm611_vm7, %v1194_v55, %v1201_v12  ;;  %v708_v12 = vadd.f32 %v706_v38, %v1222_v32 }
 0x19a   :  { %v428_v23 = vadd.f32 %v424_v43, %v372_v14  ;;  %v839_v43 = vld [vmem:[%s1298_s0 + $0x18] sm:$0xff] }
 0x19b   :  { %v370_v36 = vadd.f32 %v366_v20, %v1117_v60  ;;  %v681_v60 = vsel %vm680_vm8, %v1210_v24, %v1216_v27 }
 0x19c   :  { %v679_v34 = vpop.permute.xlu1 %678  ;;  %v497_v41 = vadd.f32 %v493_v16, %v428_v23 }
 0x19d   :  { %v684_v17 = vsel %vm680_vm8, %v679_v34, %v675_v57  ;;  %v682_v15 = vsel %vm680_vm8, %v675_v57, %v679_v34  ;;  %v426_v57 = vadd.f32 %v422_v7, %v370_v36  ;;  %v560_v34 = vmul.f32 %v553_v51, %v543_v61 }
 0x19e   :  { %v701_v44 = vmul.f32 %v695_v25, %v684_v17  ;;  %v566_v25 = vadd.f32 %v562_v3, %v497_v41  ;;  %v700_v26 = vmul.f32 %v691_v18, %v682_v15  ;;  %v629_v17 = vmul.f32 %v622_v53, %v612_v39 }
 0x19f   :  { %v495_v29 = vadd.f32 %v491_v22, %v426_v57 }
 0x1a0   :  { %v705_v45 = vadd.f32 %v701_v44, %v636_v40  ;;  %v635_v28 = vadd.f32 %v631_v0, %v566_v25  ;;  %v698_v44 = vmul.f32 %v691_v18, %v681_v60  ;;  %v840_v0 = vld [vmem:[%s1298_s0] sm:$0xff]  ;;  %v841_v25 = vld [vmem:[%s1298_s0 + $0x8] sm:$0xff] }
 0x1a1   :  { %v564_v47 = vadd.f32 %v560_v34, %v495_v29 }
 0x1a2   :  { %v704_v31 = vadd.f32 %v700_v26, %v635_v28  ;;  %v710_v19 = vadd.f32 %v706_v38, %v705_v45  ;;  %v712_v45 = vmul.f32 0.5, %v708_v12 }
 0x1a3   :  { %v633_v50 = vadd.f32 %v629_v17, %v564_v47 }
 0x1a4   :  { %v709_v40 = vadd.f32 %v706_v38, %v704_v31  ;;  %v714_v2 = vmul.f32 0.5, %v710_v19 }
 0x1a5   :  { %v702_v52 = vadd.f32 %v698_v44, %v633_v50 }
 0x1a6   :  { %v713_v42 = vmul.f32 0.5, %v709_v40 }
 0x1a7   :  { %v707_v55 = vadd.f32 %v706_v38, %v702_v52 }
 0x1a8   :  { %830 = vtanh.f32 %v713_v42 }
 0x1a9   :  { %832 = vtanh.f32 %v714_v2  ;;  %v711_v54 = vmul.f32 0.5, %v707_v55 }
 0x1ab   :  { %834 = vtanh.f32 %v711_v54 }
 0x1ac   :  { %836 = vtanh.f32 %v712_v45 }
 0x1b5   :  { %v831_v5 = vpop.eup %830 }
 0x1b6   :  { %v833_v56 = vpop.eup %832  ;;  %v721_v49 = vadd.f32 1.0, %v831_v5 }
 0x1b7   :  { %v722_v24 = vadd.f32 1.0, %v833_v56 }
 0x1b8   :  { %v725_v27 = vmul.f32 0.5, %v721_v49  ;;  %v835_v9 = vpop.eup %834 }
 0x1b9   :  { %v726_v59 = vmul.f32 0.5, %v722_v24  ;;  %v837_v10 = vpop.eup %836  ;;  %v719_v13 = vadd.f32 1.0, %v835_v9 }
 0x1ba   :  { %v733_v63 = vmul.f32 %v730_v62, %v725_v27  ;;  %v720_v1 = vadd.f32 1.0, %v837_v10 }
 0x1bb   :  { %v734_v8 = vmul.f32 %v730_v62, %v726_v59  ;;  %v723_v21 = vmul.f32 0.5, %v719_v13 }
 0x1bc   :  { %v756_v4 = vrot.slane %v733_v63, %v1015_v58  ;;  %v724_v6 = vmul.f32 0.5, %v720_v1 }
 0x1bd   :  { %v760_v32 = vrot.slane %v734_v8, %v1015_v58  ;;  %v731_v23 = vmul.f32 %v730_v62, %v723_v21 }
 0x1be   :  { %v732_v53 = vmul.f32 %v730_v62, %v724_v6 }
 0x1bf   :  { %v748_v3 = vrot.slane %v731_v23, %v1015_v58 }
 0x1c0   :  { %v752_v15 = vrot.slane %v732_v53, %v1015_v58 }
 0x1f7   :  { %v743_v11 = vpop.permute.xlu1 %742 }
 0x1f8   :  { %v763_v35 = vadd.f32 %v756_v4, %v743_v11  ;;  %v764_v14 = vadd.f32 %v760_v32, %v743_v11 }
 0x1fa   :  { %v767_v51 = vmul.f32 %v838_v37, %v763_v35  ;;  %v768_v16 = vmul.f32 %v839_v43, %v764_v14 }
 0x1fc   :  { %771 = vst [vmem:[#allocation5 + $0x10] sm:$0xff] %v767_v51  ;;  %772 = vst [vmem:[#allocation5 + $0x18] sm:$0xff] %v768_v16 }
 0x204   :  { %v738_v33 = vpop.permute.xlu0 %737 }
 0x205   :  { %v761_v41 = vadd.f32 %v748_v3, %v738_v33  ;;  %v762_v18 = vadd.f32 %v752_v15, %v738_v33 }
 0x207   :  { %v765_v46 = vmul.f32 %v840_v0, %v761_v41  ;;  %v766_v26 = vmul.f32 %v841_v25, %v762_v18 }
 0x209   :  { %769 = vst [vmem:[#allocation5] sm:$0xff] %v765_v46  ;;  %770 = vst [vmem:[#allocation5 + $0x8] sm:$0xff] %v766_v26 }
 0x20a   :  { %865 = shalt.err (!%p862_p9)
}
 0x20b   :  { %s891_s12 = smov 256  }
 0x20c   :  { %784 = dma.vmem_to_hbm [thread:$0]  %s779_s6, 512, %s1303_s5, [#allocation3], %s891_s12, %s891_s12, %s882_s4  }
 0x20d   :  { %876 = dma.done.wait [#allocation3], 512  }
 0x20e   :  { %877 = vsyncadd [#allocation3], 4294966784 }
 0x20f   :  { %788 = vsyncpa [#allocation3], 1 }
 0x210   :  { %789 = vsyncpa [#allocation4], 1 }

</bundles_post_ra>
